<compile_context>
chip_gen: v7x
topology: tpu7x:2x2x1
jax: 0.10.0
libtpu: 0.0.40
codegen_flags: <defaults>
</compile_context>

<pallas_src>
import math

import jax
import jax.numpy as jnp
from jax.experimental import pallas as pl
from jax.experimental.pallas import tpu as pltpu

SQRT2 = math.sqrt(2.0)

_LANE = 512  # samples per row; multiple of 128 -> unmasked, full-vreg loads/stores


def _cdiv(a: int, b: int) -> int:
    return -(-a // b)


def _round_up(x: int, m: int) -> int:
    return ((x + m - 1) // m) * m


def _round_down(x: int, m: int) -> int:
    return (x // m) * m


def _num_tensorcores() -> int:
    """Best-effort TensorCores-per-chip (used only for the grid heuristic)."""
    try:
        kind = jax.devices()[0].device_kind.lower()
    except Exception:
        return 1
    if "v7" in kind or "7x" in kind:
        return 2
    if "lite" in kind or "v5e" in kind or "v6" in kind:
        return 1
    if "v4" in kind or "v5p" in kind or "v5" in kind:
        return 2  # megacore generations
    return 1


def _stereo2mono_kernel(w_ref, x_ref, o_ref):
    # w_ref: (2,) channel weights in SMEM (scalar prefetch), sqrt(2) already folded in.
    # x_ref: (2, tile_rows, _LANE) stereo block in VMEM.
    # o_ref: (tile_rows, _LANE) mono output block.
    o_ref[...] = (x_ref[0] * w_ref[0] + x_ref[1] * w_ref[1]).astype(o_ref.dtype)


def stereo2mono(waveform: jax.Array, weights: jax.Array,
                *, vmem_budget_bytes: int = 24 * 1024 * 1024) -> jax.Array:
    """Pallas equivalent of Stereo2Mono.forward.

    waveform: (2, N) stereo samples (any float dtype, any N).
    weights:  (2, 1) or (2,) channel weights.
    returns:  (N,) mono = sum(waveform * weights, axis=0) * sqrt(2)
    """
    if waveform.ndim != 2 or waveform.shape[0] != 2:
        raise ValueError(f"{waveform.shape} is not a stereo waveform")
    w = jnp.asarray(weights, dtype=jnp.float32).reshape(-1)
    if w.shape[0] != 2:
        raise ValueError(f"weights must have exactly 2 entries, got shape "
                         f"{jnp.asarray(weights).shape}")
    w = w * jnp.float32(SQRT2)  # fold sqrt(2) once, outside the kernel

    n = int(waveform.shape[1])
    dtype = waveform.dtype
    bpe = jnp.dtype(dtype).itemsize
    sublane = 8 * max(1, 4 // bpe)  # dtype-aware sublane packing (f32:8, bf16:16, i8:32)

    rows = _cdiv(n, _LANE)
    total = rows * _LANE
    # Single pad (only when needed); reshape is a free, contiguous bitcast.
    x = waveform if total == n else jnp.pad(waveform, ((0, 0), (0, total - n)))
    x3 = x.reshape(2, rows, _LANE)

    # Per grid step: (2, tile_rows, LANE) input + (tile_rows, LANE) output,
    # double-buffered -> 6 tile-sized buffers in flight.
    max_tile_rows = max(sublane,
                        _round_down(vmem_budget_bytes // (6 * _LANE * bpe), sublane))
    if _num_tensorcores() >= 2 and rows >= 2 * sublane:
        # 2 TensorCores: even, >= 2 grid steps so both cores get equal work.
        tile_rows = min(max_tile_rows, _round_up(_cdiv(rows, 2), sublane))
        steps = _cdiv(rows, tile_rows)
        if steps % 2:
            tile_rows = max(sublane, _round_up(_cdiv(rows, steps + 1), sublane))
    else:
        # Single TensorCore: one maximal tile when the work fits the budget.
        tile_rows = min(max_tile_rows, rows)
    grid = (_cdiv(rows, tile_rows),)

    vmem_limit = int(max(32 * 1024 * 1024,
                         6 * tile_rows * _LANE * bpe + 4 * 1024 * 1024))

    out2d = pl.pallas_call(
        _stereo2mono_kernel,
        out_shape=jax.ShapeDtypeStruct((rows, _LANE), dtype),
        grid_spec=pltpu.PrefetchScalarGridSpec(
            num_scalar_prefetch=1,  # weights -> SMEM, available before the grid runs
            grid=grid,
            in_specs=[
                # One strided block covering both channels of this row range.
                pl.BlockSpec((2, tile_rows, _LANE), lambda i, _: (0, i, 0)),
            ],
            out_specs=pl.BlockSpec((tile_rows, _LANE), lambda i, _: (i, 0)),
        ),
        compiler_params=pltpu.CompilerParams(
            dimension_semantics=("parallel",),
            vmem_limit_bytes=vmem_limit,
        ),
        cost_estimate=pl.CostEstimate(
            flops=3 * total,                  # 2 mul + 1 add per output sample
            transcendentals=0,
            bytes_accessed=3 * total * bpe,   # read L, read R, write mono
        ),
    )(w, x3)

    out = out2d.reshape(total)
    # Tail slice only exists when N is not a multiple of 512 (< 512 padded samples).
    return out if total == n else out[:n]


if __name__ == "__main__":
    key = jax.random.PRNGKey(0)
    # ~1 second of 48 kHz stereo audio; deliberately NOT lane-aligned to exercise the
    # padded / ragged-tail path.
    N = 48_001
    waveform = jax.random.normal(key, (2, N), dtype=jnp.float32)

    # Deterministic parameter init mirroring torch.tensor([0.5, 0.5]).view(2, 1)
    weights = jnp.array([0.5, 0.5], dtype=jnp.float32).reshape(2, 1)

    fn = jax.jit(stereo2mono)
    out = jax.block_until_ready(fn(waveform, weights))

    # Reference check (plain JAX)
    ref = jnp.sum(waveform * weights, axis=0) * jnp.float32(SQRT2)
    assert out.shape == (N,)
    assert out.dtype == waveform.dtype
    assert jnp.allclose(out, ref, atol=1e-5, rtol=1e-5)

    print("KERNEL_OK")
</pallas_src>

<mosaic_0001>
module attributes {stable_mosaic.version = 11 : i64} {
  func.func @_stereo2mono_kernel(%arg0: i32, %arg1: memref<2xf32, #tpu.memory_space<smem>>, %arg2: memref<2x94x512xf32, #tpu.memory_space<vmem>>, %arg3: memref<94x512xf32, #tpu.memory_space<vmem>>) attributes {dimension_semantics = [#tpu.dimension_semantics<parallel>], iteration_bounds = array<i64: 1>, scalar_prefetch = 1 : i64, scratch_operands = 0 : i64, tpu.core_type = #tpu.core_type<tc>, window_params = [{transform_indices = @transform_0, window_bounds = array<i64: 2, 94, 512>}, {transform_indices = @transform_1, window_bounds = array<i64: 94, 512>}]} {
    %c0 = arith.constant 0 : index
    %c0_0 = arith.constant 0 : index
    %c0_1 = arith.constant 0 : index
    %0 = vector.load %arg2[%c0, %c0_0, %c0_1] : memref<2x94x512xf32, #tpu.memory_space<vmem>>, vector<1x94x512xf32>
    %1 = vector.shape_cast %0 : vector<1x94x512xf32> to vector<94x512xf32>
    %c0_2 = arith.constant 0 : index
    %2 = memref.load %arg1[%c0_2] : memref<2xf32, #tpu.memory_space<smem>>
    %3 = vector.broadcast %2 : f32 to vector<94x512xf32>
    %4 = arith.mulf %1, %3 : vector<94x512xf32>
    %c1 = arith.constant 1 : index
    %c0_3 = arith.constant 0 : index
    %c0_4 = arith.constant 0 : index
    %5 = vector.load %arg2[%c1, %c0_3, %c0_4] : memref<2x94x512xf32, #tpu.memory_space<vmem>>, vector<1x94x512xf32>
    %6 = vector.shape_cast %5 : vector<1x94x512xf32> to vector<94x512xf32>
    %c1_5 = arith.constant 1 : index
    %7 = memref.load %arg1[%c1_5] : memref<2xf32, #tpu.memory_space<smem>>
    %8 = vector.broadcast %7 : f32 to vector<94x512xf32>
    %9 = arith.mulf %6, %8 : vector<94x512xf32>
    %10 = arith.addf %4, %9 : vector<94x512xf32>
    %c0_6 = arith.constant 0 : index
    %c0_7 = arith.constant 0 : index
    %11 = vector.load %arg3[%c0_6, %c0_7] : memref<94x512xf32, #tpu.memory_space<vmem>>, vector<94x512xf32>
    tpu.vector_store %arg3[%c0_6, %c0_7], %10 {strides = array<i32>} : memref<94x512xf32, #tpu.memory_space<vmem>>, vector<94x512xf32>,
    return
  }
  func.func @transform_0(%arg0: i32, %arg1: memref<2xf32, #tpu.memory_space<smem>>) -> (i32, i32, i32) {
    %c0_i32 = arith.constant 0 : i32
    %c0_i32_0 = arith.constant 0 : i32
    %c0_i32_1 = arith.constant 0 : i32
    return %c0_i32, %arg0, %c0_i32_0 : i32, i32, i32
  }
  func.func @transform_1(%arg0: i32, %arg1: memref<2xf32, #tpu.memory_space<smem>>) -> (i32, i32) {
    %c0_i32 = arith.constant 0 : i32
    %c0_i32_0 = arith.constant 0 : i32
    return %arg0, %c0_i32 : i32, i32
  }
}

</mosaic_0001>

<bundles_post_ra>
// kernel: stereo2mono.1
= control target key start
LH: loop header
LB: loop body
LE: loop exit
PB: predicated region body
PF: predicated region fallthrough
CT: control target
= control target key end

     0   :  { %s927_s0 = inlined_call_operand.vmem [shape: f32[2], index: 0, kind: input, shape index: {}]   ;;  %s928_s1 = inlined_call_operand.vmem [shape: f32[2,94,512], index: 1, kind: input, shape index: {}]   ;;  %s929_s2 = inlined_call_operand.vmem [shape: f32[94,512], index: 2, kind: output, shape index: {}]  }
   0x1   :  { %s7_s11 = sshll.u32 %s927_s0, 4  ;;  %s8_s11 = int_to_ptr.vmem [resolvable:$true] %s7_s11 }
   0x2   :  { %s362_s12 = scalar_lea.vmem %s8_s11, 16  ;;  %p367_p1 = scmp.lt.s32.totalorder %s8_s11, %s8_s11 }
   0x3   :  { %p363_p0 = scmp.ne.s32.totalorder %s8_s11, %s362_s12  ;;  %p368_p2 = scmp.lt.s32.totalorder %s362_s12, %s362_s12 }
   0x5   :  { %p369_p3 = por %p368_p2, %p367_p1 }
   0x7   :  { %p370_p4 = pnand %p369_p3, %p363_p0 }
   0x9   :  { %373 = shalt.err (!%p370_p4)  }
   0xa   :  { %s376_s13 = smov [#allocation3]  }
   0xb   :  { %10 = dma.vmem_to_smem %s8_s11, 16, %s376_s13, [#allocation2] }
   0xc   :  { %374 = dma.done.wait [#allocation2], 16 }
   0xd   :  { %375 = vsyncadd [#allocation2], 4294967280 }
   0xe   :  { %12 = sfence }
   0xf   :  { %s63_s14 = sld [smem:[#allocation3]]  ;;  %s360_s15 = sld [smem:[#allocation3 + $0x1]]  ;;  %v15_v0 = vld [vmem:[%s928_s1] sm:$0xff]  ;;  %v16_v2 = vld [vmem:[%s928_s1 + $0x8] sm:$0xff]  ;;  %v17_v4 = vld [vmem:[%s928_s1 + $0x10] sm:$0xff] }
  0x10   :  { %v312_v1 = vld [vmem:[%s928_s1 + $0x180] sm:$0xff]  ;;  %v313_v3 = vld [vmem:[%s928_s1 + $0x188] sm:$0xff]  ;;  %v314_v5 = vld [vmem:[%s928_s1 + $0x190] sm:$0xff] }
  0x11   :  { %v18_v6 = vld [vmem:[%s928_s1 + $0x18] sm:$0xff]  ;;  %v19_v10 = vld [vmem:[%s928_s1 + $0x20] sm:$0xff]  ;;  %v20_v16 = vld [vmem:[%s928_s1 + $0x28] sm:$0xff] }
  0x12   :  { %v315_v7 = vld [vmem:[%s928_s1 + $0x198] sm:$0xff]  ;;  %v316_v11 = vld [vmem:[%s928_s1 + $0x1a0] sm:$0xff]  ;;  %v317_v17 = vld [vmem:[%s928_s1 + $0x1a8] sm:$0xff] }
  0x13   :  { %v21_v22 = vld [vmem:[%s928_s1 + $0x30] sm:$0xff]  ;;  %v22_v24 = vld [vmem:[%s928_s1 + $0x38] sm:$0xff]  ;;  %v23_v30 = vld [vmem:[%s928_s1 + $0x40] sm:$0xff] }
  0x14   :  { %v318_v23 = vld [vmem:[%s928_s1 + $0x1b0] sm:$0xff]  ;;  %v319_v29 = vld [vmem:[%s928_s1 + $0x1b8] sm:$0xff]  ;;  %v320_v31 = vld [vmem:[%s928_s1 + $0x1c0] sm:$0xff] }
  0x15   :  { %v419_v8 = vstv %s63_s14  ;;  %v421_v9 = vstv %s360_s15  ;;  %v24_v36 = vld [vmem:[%s928_s1 + $0x48] sm:$0xff]  ;;  %v25_v38 = vld [vmem:[%s928_s1 + $0x50] sm:$0xff] }
  0x16   :  { %v65_v12 = vmul.f32 %v419_v8, %v15_v0  ;;  %v164_v13 = vmul.f32 %v312_v1, %v421_v9  ;;  %v66_v14 = vmul.f32 %v419_v8, %v16_v2  ;;  %v165_v15 = vmul.f32 %v313_v3, %v421_v9  ;;  %v321_v37 = vld [vmem:[%s928_s1 + $0x1c8] sm:$0xff]  ;;  %v322_v43 = vld [vmem:[%s928_s1 + $0x1d0] sm:$0xff]  ;;  %v26_v44 = vld [vmem:[%s928_s1 + $0x58] sm:$0xff] }
  0x17   :  { %v67_v18 = vmul.f32 %v419_v8, %v17_v4  ;;  %v166_v19 = vmul.f32 %v314_v5, %v421_v9  ;;  %v68_v20 = vmul.f32 %v419_v8, %v18_v6  ;;  %v167_v21 = vmul.f32 %v315_v7, %v421_v9  ;;  %v323_v49 = vld [vmem:[%s928_s1 + $0x1d8] sm:$0xff]  ;;  %v27_v50 = vld [vmem:[%s928_s1 + $0x60] sm:$0xff]  ;;  %v28_v56 = vld [vmem:[%s928_s1 + $0x68] sm:$0xff] }
  0x18   :  { %v212_v25 = vadd.f32 %v164_v13, %v65_v12  ;;  %v213_v26 = vadd.f32 %v165_v15, %v66_v14  ;;  %v69_v27 = vmul.f32 %v419_v8, %v19_v10  ;;  %v168_v28 = vmul.f32 %v316_v11, %v421_v9  ;;  %v324_v51 = vld [vmem:[%s928_s1 + $0x1e0] sm:$0xff]  ;;  %v325_v57 = vld [vmem:[%s928_s1 + $0x1e8] sm:$0xff]  ;;  %v29_v58 = vld [vmem:[%s928_s1 + $0x70] sm:$0xff] }
  0x19   :  { %v214_v32 = vadd.f32 %v166_v19, %v67_v18  ;;  %v215_v33 = vadd.f32 %v167_v21, %v68_v20  ;;  %v70_v34 = vmul.f32 %v419_v8, %v20_v16  ;;  %v169_v35 = vmul.f32 %v317_v17, %v421_v9  ;;  %v326_v63 = vld [vmem:[%s928_s1 + $0x1f0] sm:$0xff]  ;;  %v30_v0 = vld [vmem:[%s928_s1 + $0x78] sm:$0xff]  ;;  %v31_v6 = vld [vmem:[%s928_s1 + $0x80] sm:$0xff] }
  0x1a   :  { %260 = vst [vmem:[%s929_s2] sm:$0xff] %v212_v25  ;;  %261 = vst [vmem:[%s929_s2 + $0x8] sm:$0xff] %v213_v26  ;;  %v216_v39 = vadd.f32 %v168_v28, %v69_v27  ;;  %v71_v40 = vmul.f32 %v419_v8, %v21_v22  ;;  %v170_v41 = vmul.f32 %v318_v23, %v421_v9  ;;  %v327_v5 = vld [vmem:[%s928_s1 + $0x1f8] sm:$0xff]  ;;  %v328_v7 = vld [vmem:[%s928_s1 + $0x200] sm:$0xff] }
  0x1b   :  { %v72_v42 = vmul.f32 %v419_v8, %v22_v24  ;;  %262 = vst [vmem:[%s929_s2 + $0x10] sm:$0xff] %v214_v32  ;;  %263 = vst [vmem:[%s929_s2 + $0x18] sm:$0xff] %v215_v33  ;;  %v217_v45 = vadd.f32 %v169_v35, %v70_v34  ;;  %v171_v46 = vmul.f32 %v319_v29, %v421_v9  ;;  %v32_v14 = vld [vmem:[%s928_s1 + $0x88] sm:$0xff]  ;;  %v33_v16 = vld [vmem:[%s928_s1 + $0x90] sm:$0xff] }
  0x1c   :  { %v73_v47 = vmul.f32 %v419_v8, %v23_v30  ;;  %v172_v48 = vmul.f32 %v320_v31, %v421_v9  ;;  %264 = vst [vmem:[%s929_s2 + $0x20] sm:$0xff] %v216_v39  ;;  %v218_v52 = vadd.f32 %v170_v41, %v71_v40  ;;  %v74_v53 = vmul.f32 %v419_v8, %v24_v36  ;;  %v329_v15 = vld [vmem:[%s928_s1 + $0x208] sm:$0xff]  ;;  %v330_v21 = vld [vmem:[%s928_s1 + $0x210] sm:$0xff]  ;;  %v34_v22 = vld [vmem:[%s928_s1 + $0x98] sm:$0xff] }
  0x1d   :  { %v173_v54 = vmul.f32 %v321_v37, %v421_v9  ;;  %v75_v55 = vmul.f32 %v419_v8, %v25_v38  ;;  %265 = vst [vmem:[%s929_s2 + $0x28] sm:$0xff] %v217_v45  ;;  %v219_v59 = vadd.f32 %v171_v46, %v72_v42  ;;  %v174_v61 = vmul.f32 %v322_v43, %v421_v9  ;;  %v331_v27 = vld [vmem:[%s928_s1 + $0x218] sm:$0xff]  ;;  %v35_v28 = vld [vmem:[%s928_s1 + $0xa0] sm:$0xff]  ;;  %v36_v34 = vld [vmem:[%s928_s1 + $0xa8] sm:$0xff] }
  0x1e   :  { %v220_v60 = vadd.f32 %v172_v48, %v73_v47  ;;  %v76_v62 = vmul.f32 %v419_v8, %v26_v44  ;;  %266 = vst [vmem:[%s929_s2 + $0x30] sm:$0xff] %v218_v52  ;;  %v175_v2 = vmul.f32 %v323_v49, %v421_v9  ;;  %v77_v3 = vmul.f32 %v419_v8, %v27_v50  ;;  %v332_v29 = vld [vmem:[%s928_s1 + $0x220] sm:$0xff]  ;;  %v333_v35 = vld [vmem:[%s928_s1 + $0x228] sm:$0xff]  ;;  %v37_v36 = vld [vmem:[%s928_s1 + $0xb0] sm:$0xff] }
  0x1f   :  { %v221_v1 = vadd.f32 %v173_v54, %v74_v53  ;;  %v176_v4 = vmul.f32 %v324_v51, %v421_v9  ;;  %267 = vst [vmem:[%s929_s2 + $0x38] sm:$0xff] %v219_v59  ;;  %v222_v10 = vadd.f32 %v174_v61, %v75_v55  ;;  %v78_v11 = vmul.f32 %v419_v8, %v28_v56  ;;  %v334_v41 = vld [vmem:[%s928_s1 + $0x230] sm:$0xff]  ;;  %v38_v42 = vld [vmem:[%s928_s1 + $0xb8] sm:$0xff]  ;;  %v39_v48 = vld [vmem:[%s928_s1 + $0xc0] sm:$0xff] }
  0x20   :  { %268 = vst [vmem:[%s929_s2 + $0x40] sm:$0xff] %v220_v60  ;;  %v177_v12 = vmul.f32 %v325_v57, %v421_v9  ;;  %v79_v13 = vmul.f32 %v419_v8, %v29_v58  ;;  %v223_v17 = vadd.f32 %v175_v2, %v76_v62  ;;  %v178_v19 = vmul.f32 %v326_v63, %v421_v9  ;;  %v335_v47 = vld [vmem:[%s928_s1 + $0x238] sm:$0xff]  ;;  %v336_v49 = vld [vmem:[%s928_s1 + $0x240] sm:$0xff]  ;;  %v40_v54 = vld [vmem:[%s928_s1 + $0xc8] sm:$0xff] }
  0x21   :  { %269 = vst [vmem:[%s929_s2 + $0x48] sm:$0xff] %v221_v1  ;;  %v224_v18 = vadd.f32 %v176_v4, %v77_v3  ;;  %v80_v20 = vmul.f32 %v419_v8, %v30_v0  ;;  %270 = vst [vmem:[%s929_s2 + $0x50] sm:$0xff] %v222_v10  ;;  %v179_v24 = vmul.f32 %v327_v5, %v421_v9  ;;  %v337_v55 = vld [vmem:[%s928_s1 + $0x248] sm:$0xff]  ;;  %v41_v56 = vld [vmem:[%s928_s1 + $0xd0] sm:$0xff] }
  0x22   :  { %v225_v23 = vadd.f32 %v177_v12, %v78_v11  ;;  %v81_v25 = vmul.f32 %v419_v8, %v31_v6  ;;  %v180_v26 = vmul.f32 %v328_v7, %v421_v9  ;;  %271 = vst [vmem:[%s929_s2 + $0x58] sm:$0xff] %v223_v17  ;;  %v226_v30 = vadd.f32 %v178_v19, %v79_v13  ;;  %v338_v61 = vld [vmem:[%s928_s1 + $0x250] sm:$0xff]  ;;  %v42_v62 = vld [vmem:[%s928_s1 + $0xd8] sm:$0xff]  ;;  %v43_v4 = vld [vmem:[%s928_s1 + $0xe0] sm:$0xff] }
  0x23   :  { %272 = vst [vmem:[%s929_s2 + $0x60] sm:$0xff] %v224_v18  ;;  %v82_v31 = vmul.f32 %v419_v8, %v32_v14  ;;  %v181_v32 = vmul.f32 %v329_v15, %v421_v9  ;;  %v83_v33 = vmul.f32 %v419_v8, %v33_v16  ;;  %v227_v37 = vadd.f32 %v179_v24, %v80_v20  ;;  %v339_v3 = vld [vmem:[%s928_s1 + $0x258] sm:$0xff]  ;;  %v340_v5 = vld [vmem:[%s928_s1 + $0x260] sm:$0xff]  ;;  %v44_v12 = vld [vmem:[%s928_s1 + $0xe8] sm:$0xff] }
  0x24   :  { %273 = vst [vmem:[%s929_s2 + $0x68] sm:$0xff] %v225_v23  ;;  %v228_v38 = vadd.f32 %v180_v26, %v81_v25  ;;  %v182_v39 = vmul.f32 %v330_v21, %v421_v9  ;;  %v84_v40 = vmul.f32 %v419_v8, %v34_v22  ;;  %274 = vst [vmem:[%s929_s2 + $0x70] sm:$0xff] %v226_v30  ;;  %v341_v13 = vld [vmem:[%s928_s1 + $0x268] sm:$0xff]  ;;  %v45_v14 = vld [vmem:[%s928_s1 + $0xf0] sm:$0xff] }
  0x25   :  { %v229_v43 = vadd.f32 %v181_v32, %v82_v31  ;;  %v183_v44 = vmul.f32 %v331_v27, %v421_v9  ;;  %v85_v45 = vmul.f32 %v419_v8, %v35_v28  ;;  %v184_v46 = vmul.f32 %v332_v29, %v421_v9  ;;  %275 = vst [vmem:[%s929_s2 + $0x78] sm:$0xff] %v227_v37  ;;  %v342_v19 = vld [vmem:[%s928_s1 + $0x270] sm:$0xff]  ;;  %v46_v20 = vld [vmem:[%s928_s1 + $0xf8] sm:$0xff]  ;;  %v47_v26 = vld [vmem:[%s928_s1 + $0x100] sm:$0xff] }
  0x26   :  { %276 = vst [vmem:[%s929_s2 + $0x80] sm:$0xff] %v228_v38  ;;  %v230_v50 = vadd.f32 %v182_v39, %v83_v33  ;;  %v86_v51 = vmul.f32 %v419_v8, %v36_v34  ;;  %v185_v52 = vmul.f32 %v333_v35, %v421_v9  ;;  %v87_v53 = vmul.f32 %v419_v8, %v37_v36  ;;  %v343_v25 = vld [vmem:[%s928_s1 + $0x278] sm:$0xff]  ;;  %v344_v27 = vld [vmem:[%s928_s1 + $0x280] sm:$0xff]  ;;  %v48_v32 = vld [vmem:[%s928_s1 + $0x108] sm:$0xff] }
  0x27   :  { %277 = vst [vmem:[%s929_s2 + $0x88] sm:$0xff] %v229_v43  ;;  %v231_v57 = vadd.f32 %v183_v44, %v84_v40  ;;  %v232_v58 = vadd.f32 %v184_v46, %v85_v45  ;;  %v186_v59 = vmul.f32 %v334_v41, %v421_v9  ;;  %v88_v60 = vmul.f32 %v419_v8, %v38_v42  ;;  %v345_v33 = vld [vmem:[%s928_s1 + $0x288] sm:$0xff]  ;;  %v49_v34 = vld [vmem:[%s928_s1 + $0x110] sm:$0xff]  ;;  %v50_v40 = vld [vmem:[%s928_s1 + $0x118] sm:$0xff] }
  0x28   :  { %278 = vst [vmem:[%s929_s2 + $0x90] sm:$0xff] %v230_v50  ;;  %v233_v63 = vadd.f32 %v185_v52, %v86_v51  ;;  %v187_v0 = vmul.f32 %v335_v47, %v421_v9  ;;  %v89_v1 = vmul.f32 %v419_v8, %v39_v48  ;;  %v188_v2 = vmul.f32 %v336_v49, %v421_v9  ;;  %v346_v39 = vld [vmem:[%s928_s1 + $0x290] sm:$0xff]  ;;  %v347_v45 = vld [vmem:[%s928_s1 + $0x298] sm:$0xff]  ;;  %v51_v46 = vld [vmem:[%s928_s1 + $0x120] sm:$0xff] }
  0x29   :  { %279 = vst [vmem:[%s929_s2 + $0x98] sm:$0xff] %v231_v57  ;;  %280 = vst [vmem:[%s929_s2 + $0xa0] sm:$0xff] %v232_v58  ;;  %v234_v6 = vadd.f32 %v186_v59, %v87_v53  ;;  %v90_v7 = vmul.f32 %v419_v8, %v40_v54  ;;  %v189_v10 = vmul.f32 %v337_v55, %v421_v9  ;;  %v348_v47 = vld [vmem:[%s928_s1 + $0x2a0] sm:$0xff]  ;;  %v52_v52 = vld [vmem:[%s928_s1 + $0x128] sm:$0xff] }
  0x2a   :  { %v91_v11 = vmul.f32 %v419_v8, %v41_v56  ;;  %281 = vst [vmem:[%s929_s2 + $0xa8] sm:$0xff] %v233_v63  ;;  %v235_v15 = vadd.f32 %v187_v0, %v88_v60  ;;  %v236_v16 = vadd.f32 %v188_v2, %v89_v1  ;;  %v190_v17 = vmul.f32 %v338_v61, %v421_v9  ;;  %v349_v53 = vld [vmem:[%s928_s1 + $0x2a8] sm:$0xff]  ;;  %v53_v54 = vld [vmem:[%s928_s1 + $0x130] sm:$0xff]  ;;  %v54_v60 = vld [vmem:[%s928_s1 + $0x138] sm:$0xff] }
  0x2b   :  { %v92_v18 = vmul.f32 %v419_v8, %v42_v62  ;;  %282 = vst [vmem:[%s929_s2 + $0xb0] sm:$0xff] %v234_v6  ;;  %v237_v21 = vadd.f32 %v189_v10, %v90_v7  ;;  %v191_v22 = vmul.f32 %v339_v3, %v421_v9  ;;  %v93_v23 = vmul.f32 %v419_v8, %v43_v4  ;;  %v350_v59 = vld [vmem:[%s928_s1 + $0x2b0] sm:$0xff]  ;;  %v351_v1 = vld [vmem:[%s928_s1 + $0x2b8] sm:$0xff]  ;;  %v55_v2 = vld [vmem:[%s928_s1 + $0x140] sm:$0xff] }
  0x2c   :  { %v192_v24 = vmul.f32 %v340_v5, %v421_v9  ;;  %283 = vst [vmem:[%s929_s2 + $0xb8] sm:$0xff] %v235_v15  ;;  %284 = vst [vmem:[%s929_s2 + $0xc0] sm:$0xff] %v236_v16  ;;  %v238_v28 = vadd.f32 %v190_v17, %v91_v11  ;;  %v94_v29 = vmul.f32 %v419_v8, %v44_v12  ;;  %v352_v3 = vld [vmem:[%s928_s1 + $0x2c0] sm:$0xff]  ;;  %v56_v10 = vld [vmem:[%s928_s1 + $0x148] sm:$0xff] }
  0x2d   :  { %v193_v30 = vmul.f32 %v341_v13, %v421_v9  ;;  %v95_v31 = vmul.f32 %v419_v8, %v45_v14  ;;  %285 = vst [vmem:[%s929_s2 + $0xc8] sm:$0xff] %v237_v21  ;;  %v239_v35 = vadd.f32 %v191_v22, %v92_v18  ;;  %v194_v37 = vmul.f32 %v342_v19, %v421_v9  ;;  %v353_v11 = vld [vmem:[%s928_s1 + $0x2c8] sm:$0xff]  ;;  %v57_v12 = vld [vmem:[%s928_s1 + $0x150] sm:$0xff]  ;;  %v58_v18 = vld [vmem:[%s928_s1 + $0x158] sm:$0xff] }
  0x2e   :  { %v240_v36 = vadd.f32 %v192_v24, %v93_v23  ;;  %v96_v38 = vmul.f32 %v419_v8, %v46_v20  ;;  %286 = vst [vmem:[%s929_s2 + $0xd0] sm:$0xff] %v238_v28  ;;  %v195_v42 = vmul.f32 %v343_v25, %v421_v9  ;;  %v97_v43 = vmul.f32 %v419_v8, %v47_v26  ;;  %v354_v17 = vld [vmem:[%s928_s1 + $0x2d0] sm:$0xff]  ;;  %v355_v23 = vld [vmem:[%s928_s1 + $0x2d8] sm:$0xff]  ;;  %v59_v24 = vld [vmem:[%s928_s1 + $0x160] sm:$0x3f] }
  0x2f   :  { %v241_v41 = vadd.f32 %v193_v30, %v94_v29  ;;  %v196_v44 = vmul.f32 %v344_v27, %v421_v9  ;;  %287 = vst [vmem:[%s929_s2 + $0xd8] sm:$0xff] %v239_v35  ;;  %v242_v48 = vadd.f32 %v194_v37, %v95_v31  ;;  %v98_v49 = vmul.f32 %v419_v8, %v48_v32  ;;  %v356_v25 = vld [vmem:[%s928_s1 + $0x2e0] sm:$0x3f]  ;;  %v60_v30 = vld [vmem:[%s928_s1 + $0x168] sm:$0x3f] }
  0x30   :  { %288 = vst [vmem:[%s929_s2 + $0xe0] sm:$0xff] %v240_v36  ;;  %v197_v50 = vmul.f32 %v345_v33, %v421_v9  ;;  %v99_v51 = vmul.f32 %v419_v8, %v49_v34  ;;  %v243_v55 = vadd.f32 %v195_v42, %v96_v38  ;;  %v198_v57 = vmul.f32 %v346_v39, %v421_v9  ;;  %v357_v31 = vld [vmem:[%s928_s1 + $0x2e8] sm:$0x3f]  ;;  %v61_v32 = vld [vmem:[%s928_s1 + $0x170] sm:$0x3f] }
  0x31   :  { %289 = vst [vmem:[%s929_s2 + $0xe8] sm:$0xff] %v241_v41  ;;  %v244_v56 = vadd.f32 %v196_v44, %v97_v43  ;;  %v100_v58 = vmul.f32 %v419_v8, %v50_v40  ;;  %290 = vst [vmem:[%s929_s2 + $0xf0] sm:$0xff] %v242_v48  ;;  %v199_v62 = vmul.f32 %v347_v45, %v421_v9  ;;  %v358_v37 = vld [vmem:[%s928_s1 + $0x2f0] sm:$0x3f]  ;;  %v62_v38 = vld [vmem:[%s928_s1 + $0x178] sm:$0x3f] }
  0x32   :  { %v245_v61 = vadd.f32 %v197_v50, %v98_v49  ;;  %v101_v63 = vmul.f32 %v419_v8, %v51_v46  ;;  %v200_v0 = vmul.f32 %v348_v47, %v421_v9  ;;  %291 = vst [vmem:[%s929_s2 + $0xf8] sm:$0xff] %v243_v55  ;;  %v246_v4 = vadd.f32 %v198_v57, %v99_v51  ;;  %v359_v43 = vld [vmem:[%s928_s1 + $0x2f8] sm:$0x3f] }
  0x33   :  { %292 = vst [vmem:[%s929_s2 + $0x100] sm:$0xff] %v244_v56  ;;  %v102_v5 = vmul.f32 %v419_v8, %v52_v52  ;;  %v201_v6 = vmul.f32 %v349_v53, %v421_v9  ;;  %v103_v7 = vmul.f32 %v419_v8, %v53_v54  ;;  %v247_v13 = vadd.f32 %v199_v62, %v100_v58 }
  0x34   :  { %293 = vst [vmem:[%s929_s2 + $0x108] sm:$0xff] %v245_v61  ;;  %v248_v14 = vadd.f32 %v200_v0, %v101_v63  ;;  %v202_v15 = vmul.f32 %v350_v59, %v421_v9  ;;  %v104_v16 = vmul.f32 %v419_v8, %v54_v60  ;;  %294 = vst [vmem:[%s929_s2 + $0x110] sm:$0xff] %v246_v4 }
  0x35   :  { %v249_v19 = vadd.f32 %v201_v6, %v102_v5  ;;  %v203_v20 = vmul.f32 %v351_v1, %v421_v9  ;;  %v105_v21 = vmul.f32 %v419_v8, %v55_v2  ;;  %v204_v22 = vmul.f32 %v352_v3, %v421_v9  ;;  %295 = vst [vmem:[%s929_s2 + $0x118] sm:$0xff] %v247_v13 }
  0x36   :  { %296 = vst [vmem:[%s929_s2 + $0x120] sm:$0xff] %v248_v14  ;;  %v250_v26 = vadd.f32 %v202_v15, %v103_v7  ;;  %v106_v27 = vmul.f32 %v419_v8, %v56_v10  ;;  %v205_v28 = vmul.f32 %v353_v11, %v421_v9  ;;  %v107_v29 = vmul.f32 %v419_v8, %v57_v12 }
  0x37   :  { %297 = vst [vmem:[%s929_s2 + $0x128] sm:$0xff] %v249_v19  ;;  %v251_v33 = vadd.f32 %v203_v20, %v104_v16  ;;  %v252_v34 = vadd.f32 %v204_v22, %v105_v21  ;;  %v206_v35 = vmul.f32 %v354_v17, %v421_v9  ;;  %v108_v36 = vmul.f32 %v419_v8, %v58_v18 }
  0x38   :  { %298 = vst [vmem:[%s929_s2 + $0x130] sm:$0xff] %v250_v26  ;;  %v253_v39 = vadd.f32 %v205_v28, %v106_v27  ;;  %v207_v40 = vmul.f32 %v355_v23, %v421_v9  ;;  %v109_v41 = vmul.f32 %v419_v8, %v59_v24  ;;  %v208_v42 = vmul.f32 %v356_v25, %v421_v9 }
  0x39   :  { %299 = vst [vmem:[%s929_s2 + $0x138] sm:$0xff] %v251_v33  ;;  %300 = vst [vmem:[%s929_s2 + $0x140] sm:$0xff] %v252_v34  ;;  %v254_v44 = vadd.f32 %v206_v35, %v107_v29  ;;  %v110_v45 = vmul.f32 %v419_v8, %v60_v30  ;;  %v209_v46 = vmul.f32 %v357_v31, %v421_v9 }
  0x3a   :  { %v111_v47 = vmul.f32 %v419_v8, %v61_v32  ;;  %301 = vst [vmem:[%s929_s2 + $0x148] sm:$0xff] %v253_v39  ;;  %v255_v48 = vadd.f32 %v207_v40, %v108_v36  ;;  %v256_v49 = vadd.f32 %v208_v42, %v109_v41  ;;  %v210_v50 = vmul.f32 %v358_v37, %v421_v9 }
  0x3b   :  { %v112_v51 = vmul.f32 %v419_v8, %v62_v38  ;;  %302 = vst [vmem:[%s929_s2 + $0x150] sm:$0xff] %v254_v44  ;;  %v257_v52 = vadd.f32 %v209_v46, %v110_v45  ;;  %v211_v53 = vmul.f32 %v359_v43, %v421_v9 }
  0x3c   :  { %303 = vst [vmem:[%s929_s2 + $0x158] sm:$0xff] %v255_v48  ;;  %304 = vst [vmem:[%s929_s2 + $0x160] sm:$0x3f] %v256_v49  ;;  %v258_v54 = vadd.f32 %v210_v50, %v111_v47 }
  0x3d   :  { %305 = vst [vmem:[%s929_s2 + $0x168] sm:$0x3f] %v257_v52  ;;  %v259_v8 = vadd.f32 %v211_v53, %v112_v51 }
  0x3e   :  { %306 = vst [vmem:[%s929_s2 + $0x170] sm:$0x3f] %v258_v54 }
  0x3f   :  { %307 = vst [vmem:[%s929_s2 + $0x178] sm:$0x3f] %v259_v8 }

</bundles_post_ra>
